<compile_context>
chip_gen: v7x
topology: tpu7x:2x2x1
jax: 0.10.0
libtpu: 0.0.40
codegen_flags: <defaults>
</compile_context>

<pallas_src>
import jax
import jax.numpy as jnp
from jax.experimental import pallas as pl
from jax.experimental.pallas import tpu as pltpu


LANE = 128  # TPU lane width; pad the hidden dim to a multiple of this.


def _round_up(x, m):
    return ((x + m - 1) // m) * m


# ----------------------------------------------------------------------------
# Kernel 1: fused embedding gather + gate-concat input->hidden projection
# ----------------------------------------------------------------------------
def embed_gi_kernel(ids_ref,    # (tm, 1)    int32 token ids
                    emb_ref,    # (V, Hp)    embedding table (matmul dtype)
                    wih_ref,    # (Hp, 3Hp)  [W_ir^T | W_iz^T | W_in^T]
                    bias_ref,   # (1, 3Hp)   folded biases (f32)
                    gi_ref):    # (tm, 3Hp)  output (stream dtype)
    tm = ids_ref.shape[0]
    vocab = emb_ref.shape[0]

    # Embedding gather as a one-hot MXU matmul (fine for tiny vocab).
    ids = ids_ref[...]                                            # (tm, 1)
    iota = jax.lax.broadcasted_iota(jnp.int32, (tm, vocab), 1)    # (tm, V)
    onehot = (ids == iota).astype(emb_ref.dtype)                  # (tm, V)
    x = jnp.dot(onehot, emb_ref[...],
                preferred_element_type=jnp.float32)               # (tm, Hp) f32

    # Single gate-concatenated matmul + one lane-dense store.
    gi = jnp.dot(x.astype(wih_ref.dtype), wih_ref[...],
                 preferred_element_type=jnp.float32) + bias_ref[...]
    gi_ref[...] = gi.astype(gi_ref.dtype)


def embed_gi_pallas(ids2d, emb, wih_cat, bias_cat, *, stream_dtype, row_tile=512):
    tb = ids2d.shape[0]
    vocab, hp = emb.shape
    three_h = wih_cat.shape[1]
    tm = min(row_tile, tb)
    if tb % tm:
        tm = tb  # toy-shape fallback; production TB should divide row_tile
    return pl.pallas_call(
        embed_gi_kernel,
        out_shape=jax.ShapeDtypeStruct((tb, three_h), stream_dtype),
        grid_spec=pltpu.PrefetchScalarGridSpec(
            num_scalar_prefetch=0,
            grid=(tb // tm,),                 # row-tiled; megacore-shardable
            in_specs=[
                pl.BlockSpec((tm, 1), lambda r: (r, 0)),        # ids (tiled)
                pl.BlockSpec((vocab, hp), lambda r: (0, 0)),    # emb (resident)
                pl.BlockSpec((hp, three_h), lambda r: (0, 0)),  # W_i^T concat
                pl.BlockSpec((1, three_h), lambda r: (0, 0)),   # folded biases
            ],
            out_specs=pl.BlockSpec((tm, three_h), lambda r: (r, 0)),
        ),
        compiler_params=pltpu.CompilerParams(
            dimension_semantics=("parallel",),
            vmem_limit_bytes=32 * 1024 * 1024),
    )(ids2d, emb, wih_cat, bias_cat)


# ----------------------------------------------------------------------------
# Kernel 2: GRU recurrence, t_chunk time steps per grid iteration
# ----------------------------------------------------------------------------
def gru_recurrence_pallas(gi, h0, whh_cat, bhn, *, out_dtype, t_chunk, t_real):
    t_pad, b, three_h = gi.shape
    hp = three_h // 3
    n_chunks = t_pad // t_chunk
    last_chunk = (t_real - 1) // t_chunk   # grid iter containing last real step
    last_t = (t_real - 1) % t_chunk        # unrolled index of last real step

    def kernel(gi_ref,      # (Tc, B, 3Hp) precomputed input projections
               h0_ref,      # (1, B, Hp)   initial hidden
               whh_ref,     # (Hp, 3Hp)    [W_hr^T | W_hz^T | W_hn^T]
               bhn_ref,     # (1, Hp)      b_hn (f32)
               out_ref,     # (Tc, B, Hp)  output hidden stream
               hn_ref,      # (1, B, Hp)   final hidden (f32), written once
               h_scratch):  # (B, Hp) f32  hidden carried across chunks
        @pl.when(pl.program_id(0) == 0)
        def _init():
            h_scratch[...] = h0_ref[0].astype(jnp.float32)

        whh = whh_ref[...]                       # hoisted constants
        bhn_v = bhn_ref[...].astype(jnp.float32)

        # Register-carried hidden: h_scratch touched once per chunk, not per step.
        h = h_scratch[...]
        for t in range(t_chunk):                 # capped static unroll
            # One MXU op per step (gate-concat), f32 accumulation.
            gh = jnp.dot(h.astype(whh.dtype), whh,
                         preferred_element_type=jnp.float32)     # (B, 3Hp)
            gi_t = gi_ref[t].astype(jnp.float32)                 # (B, 3Hp)
            r = jax.nn.sigmoid(gi_t[:, :hp] + gh[:, :hp])
            z = jax.nn.sigmoid(gi_t[:, hp:2 * hp] + gh[:, hp:2 * hp])
            n = jnp.tanh(gi_t[:, 2 * hp:] + r * (gh[:, 2 * hp:] + bhn_v))
            h = (1.0 - z) * n + z * h
            out_ref[t] = h.astype(out_ref.dtype)                 # lane-dense vst
            if t == last_t:  # static condition: emit h_n at the last REAL step
                @pl.when(pl.program_id(0) == last_chunk)
                def _write_hn():
                    hn_ref[0] = h
        h_scratch[...] = h

    gate_spec = pl.BlockSpec((t_chunk, b, three_h), lambda c: (c, 0, 0))
    return pl.pallas_call(
        kernel,
        out_shape=(jax.ShapeDtypeStruct((t_pad, b, hp), out_dtype),
                   jax.ShapeDtypeStruct((1, b, hp), jnp.float32)),
        grid_spec=pltpu.PrefetchScalarGridSpec(
            num_scalar_prefetch=0,
            grid=(n_chunks,),
            in_specs=[
                gate_spec,                                        # gi stream
                pl.BlockSpec((1, b, hp), lambda c: (0, 0, 0)),    # h0
                pl.BlockSpec((hp, three_h), lambda c: (0, 0)),    # W_h^T concat
                pl.BlockSpec((1, hp), lambda c: (0, 0)),          # b_hn
            ],
            out_specs=[
                pl.BlockSpec((t_chunk, b, hp), lambda c: (c, 0, 0)),
                pl.BlockSpec((1, b, hp), lambda c: (0, 0, 0)),    # resident h_n
            ],
            scratch_shapes=[pltpu.VMEM((b, hp), jnp.float32)],
        ),
        compiler_params=pltpu.CompilerParams(
            dimension_semantics=("arbitrary",),    # time recurrence is serial
            vmem_limit_bytes=32 * 1024 * 1024),
    )(gi, h0, whh_cat, bhn)


# ----------------------------------------------------------------------------
# EncoderRNN.forward
# ----------------------------------------------------------------------------
def encoder_rnn_forward(inp, hidden, params, *,
                        matmul_dtype=jnp.bfloat16,
                        stream_dtype=jnp.bfloat16,
                        out_dtype=jnp.bfloat16,
                        t_chunk=8):
    """inp: (T, B) int32 token ids; hidden: (1, B, H) f32.

    Returns (output, h_n): output (T, B, H) in `out_dtype`, h_n (1, B, H) f32.
    """
    T, B = inp.shape
    V, H = params["embedding"].shape
    Hp = _round_up(H, LANE)                 # lane-dense stores (H=32 -> 128)

    t_chunk = max(1, min(t_chunk, T))
    T_pad = _round_up(T, t_chunk)           # pad time instead of shrinking t_chunk

    w_ih, w_hh = params["w_ih"], params["w_hh"]   # (3H, H), gate order r,z,n
    b_ih, b_hh = params["b_ih"], params["b_hh"]   # (3H,)

    def pad_wt(w_gate):                     # (H, H) gate weight -> (Hp, Hp) W^T
        return jnp.pad(w_gate.T, ((0, Hp - H), (0, Hp - H)))

    def pad_b(v):
        return jnp.pad(v, (0, Hp - H))

    # Gate-concatenated, pre-transposed, zero-padded weights (bf16 MXU operands).
    wih_cat = jnp.concatenate(
        [pad_wt(w_ih[0:H]), pad_wt(w_ih[H:2 * H]), pad_wt(w_ih[2 * H:])],
        axis=1).astype(matmul_dtype)                            # (Hp, 3Hp)
    whh_cat = jnp.concatenate(
        [pad_wt(w_hh[0:H]), pad_wt(w_hh[H:2 * H]), pad_wt(w_hh[2 * H:])],
        axis=1).astype(matmul_dtype)                            # (Hp, 3Hp)

    # Fold b_ih (all gates) and b_hh (r, z) into the precomputed gi stream;
    # only b_hn must stay in the recurrence (it sits inside r * (...)).
    bias_cat = jnp.concatenate(
        [pad_b(b_ih[0:H] + b_hh[0:H]),
         pad_b(b_ih[H:2 * H] + b_hh[H:2 * H]),
         pad_b(b_ih[2 * H:])]).reshape(1, 3 * Hp).astype(jnp.float32)
    bhn = pad_b(b_hh[2 * H:]).reshape(1, Hp).astype(jnp.float32)

    emb = jnp.pad(params["embedding"],
                  ((0, 0), (0, Hp - H))).astype(matmul_dtype)   # (V, Hp)

    inp_pad = jnp.pad(inp, ((0, T_pad - T), (0, 0)))            # pad ids with 0
    ids2d = inp_pad.reshape(T_pad * B, 1).astype(jnp.int32)

    h0 = jnp.pad(hidden.astype(jnp.float32),
                 ((0, 0), (0, 0), (0, Hp - H)))                 # (1, B, Hp)

    # Fully-parallel batched embedding + input->hidden projection.
    gi = embed_gi_pallas(ids2d, emb, wih_cat, bias_cat,
                         stream_dtype=stream_dtype)             # (T_pad*B, 3Hp)
    gi = gi.reshape(T_pad, B, 3 * Hp)

    # Serial recurrence (hidden->hidden work only).
    out_full, hn_full = gru_recurrence_pallas(
        gi, h0, whh_cat, bhn, out_dtype=out_dtype, t_chunk=t_chunk, t_real=T)

    output = out_full[:T, :, :H]     # drop time/lane padding
    hn = hn_full[:, :, :H]
    return output, hn


# ----------------------------------------------------------------------------
# Pure-JAX reference (PyTorch nn.GRU semantics, gate order r,z,n) + init
# ----------------------------------------------------------------------------
def gru_reference(embedded, hidden, w_ih, w_hh, b_ih, b_hh):
    H = hidden.shape[-1]

    def step(h, x):
        gi = x @ w_ih.T + b_ih
        gh = h @ w_hh.T + b_hh
        i_r, i_z, i_n = gi[:, :H], gi[:, H:2 * H], gi[:, 2 * H:]
        h_r, h_z, h_n = gh[:, :H], gh[:, H:2 * H], gh[:, 2 * H:]
        r = jax.nn.sigmoid(i_r + h_r)
        z = jax.nn.sigmoid(i_z + h_z)
        n = jnp.tanh(i_n + r * h_n)
        h_new = (1.0 - z) * n + z * h
        return h_new, h_new

    h_last, outs = jax.lax.scan(step, hidden[0], embedded)
    return outs, h_last[None]


def init_params(key, input_size, hidden_size):
    k_emb, k0, k1, k2, k3 = jax.random.split(key, 5)
    bound = 1.0 / jnp.sqrt(hidden_size)
    return {
        "embedding": jax.random.normal(k_emb, (input_size, hidden_size), jnp.float32),
        "w_ih": jax.random.uniform(k0, (3 * hidden_size, hidden_size),
                                   jnp.float32, -bound, bound),
        "w_hh": jax.random.uniform(k1, (3 * hidden_size, hidden_size),
                                   jnp.float32, -bound, bound),
        "b_ih": jax.random.uniform(k2, (3 * hidden_size,), jnp.float32, -bound, bound),
        "b_hh": jax.random.uniform(k3, (3 * hidden_size,), jnp.float32, -bound, bound),
    }


if __name__ == "__main__":
    INPUT_SIZE = 16   # vocab size
    HIDDEN = 32
    T, B = 8, 2

    key = jax.random.PRNGKey(0)
    k_params, k_inp = jax.random.split(key)
    params = init_params(k_params, INPUT_SIZE, HIDDEN)

    inp = jax.random.randint(k_inp, (T, B), 0, INPUT_SIZE, dtype=jnp.int32)
    hidden = jnp.zeros((1, B, HIDDEN), jnp.float32)   # EncoderRNN.initHidden

    output, hn = encoder_rnn_forward(inp, hidden, params)
    output = jax.block_until_ready(output)
    hn = jax.block_until_ready(hn)

    # Cross-check against pure-JAX f32 GRU reference. Tolerance loosened for
    # bf16 matmul operands / gi stream / bf16 output; accumulation stays f32.
    embedded = jnp.take(params["embedding"], inp, axis=0)
    ref_out, ref_hn = gru_reference(embedded, hidden, params["w_ih"],
                                    params["w_hh"], params["b_ih"], params["b_hh"])
    assert output.shape == (T, B, HIDDEN) and hn.shape == (1, B, HIDDEN)
    assert jnp.allclose(output.astype(jnp.float32), ref_out, rtol=2e-2, atol=2e-2)
    assert jnp.allclose(hn, ref_hn, rtol=2e-2, atol=2e-2)

    print("KERNEL_OK")
</pallas_src>

<mosaic_0001>
module attributes {stable_mosaic.version = 11 : i64} {
  func.func @embed_gi_kernel(%arg0: i32, %arg1: memref<16x1xi32, #tpu.memory_space<vmem>>, %arg2: memref<16x128xbf16, #tpu.memory_space<vmem>>, %arg3: memref<128x384xbf16, #tpu.memory_space<vmem>>, %arg4: memref<1x384xf32, #tpu.memory_space<vmem>>, %arg5: memref<16x384xbf16, #tpu.memory_space<vmem>>) attributes {dimension_semantics = [#tpu.dimension_semantics<parallel>], iteration_bounds = array<i64: 1>, scalar_prefetch = 0 : i64, scratch_operands = 0 : i64, tpu.core_type = #tpu.core_type<tc>, window_params = [{transform_indices = @transform_0, window_bounds = array<i64: 16, 1>}, {pipeline_mode = #tpu.pipeline_mode<synchronous>, transform_indices = @transform_1, window_bounds = array<i64: 16, 128>}, {pipeline_mode = #tpu.pipeline_mode<synchronous>, transform_indices = @transform_2, window_bounds = array<i64: 128, 384>}, {pipeline_mode = #tpu.pipeline_mode<synchronous>, transform_indices = @transform_3, window_bounds = array<i64: 1, 384>}, {transform_indices = @transform_4, window_bounds = array<i64: 16, 384>}]} {
    %c0 = arith.constant 0 : index
    %c0_0 = arith.constant 0 : index
    %0 = vector.load %arg1[%c0, %c0_0] : memref<16x1xi32, #tpu.memory_space<vmem>>, vector<16x1xi32>
    %1 = tpu.iota {dimensions = array<i32: 1>} : vector<16x16xi32>
    %2 = vector.broadcast %0 : vector<16x1xi32> to vector<16x16xi32>
    %3 = arith.cmpi eq, %2, %1 : vector<16x16xi32>
    %4 = arith.extui %3 : vector<16x16xi1> to vector<16x16xi32>
    %5 = arith.sitofp %4 : vector<16x16xi32> to vector<16x16xf32>
    %6 = arith.truncf %5 : vector<16x16xf32> to vector<16x16xbf16>
    %c0_1 = arith.constant 0 : index
    %c0_2 = arith.constant 0 : index
    %7 = vector.load %arg2[%c0_1, %c0_2] : memref<16x128xbf16, #tpu.memory_space<vmem>>, vector<16x128xbf16>
    %cst = arith.constant dense<0.000000e+00> : vector<16x128xf32>
    %8 = tpu.matmul %6, %7, %cst {dimension_numbers = #tpu.dot_dimension_numbers<[1], [0], [0], [1], [0, 0, 1, 1], [], []>} : vector<16x16xbf16>, vector<16x128xbf16>, vector<16x128xf32> -> vector<16x128xf32>
    %9 = arith.truncf %8 : vector<16x128xf32> to vector<16x128xbf16>
    %c0_3 = arith.constant 0 : index
    %c0_4 = arith.constant 0 : index
    %10 = vector.load %arg3[%c0_3, %c0_4] : memref<128x384xbf16, #tpu.memory_space<vmem>>, vector<128x384xbf16>
    %cst_5 = arith.constant dense<0.000000e+00> : vector<16x384xf32>
    %11 = tpu.matmul %9, %10, %cst_5 {dimension_numbers = #tpu.dot_dimension_numbers<[1], [0], [0], [1], [0, 0, 1, 1], [], []>} : vector<16x128xbf16>, vector<128x384xbf16>, vector<16x384xf32> -> vector<16x384xf32>
    %c0_6 = arith.constant 0 : index
    %c0_7 = arith.constant 0 : index
    %12 = vector.load %arg4[%c0_6, %c0_7] : memref<1x384xf32, #tpu.memory_space<vmem>>, vector<1x384xf32>
    %13 = vector.broadcast %12 : vector<1x384xf32> to vector<16x384xf32>
    %14 = arith.addf %11, %13 : vector<16x384xf32>
    %15 = arith.truncf %14 : vector<16x384xf32> to vector<16x384xbf16>
    %c0_8 = arith.constant 0 : index
    %c0_9 = arith.constant 0 : index
    %16 = vector.load %arg5[%c0_8, %c0_9] : memref<16x384xbf16, #tpu.memory_space<vmem>>, vector<16x384xbf16>
    tpu.vector_store %arg5[%c0_8, %c0_9], %15 {strides = array<i32>} : memref<16x384xbf16, #tpu.memory_space<vmem>>, vector<16x384xbf16>,
    return
  }
  func.func @transform_0(%arg0: i32) -> (i32, i32) {
    %c0_i32 = arith.constant 0 : i32
    %c0_i32_0 = arith.constant 0 : i32
    return %arg0, %c0_i32 : i32, i32
  }
  func.func @transform_1(%arg0: i32) -> (i32, i32) {
    %c0_i32 = arith.constant 0 : i32
    %c0_i32_0 = arith.constant 0 : i32
    %c0_i32_1 = arith.constant 0 : i32
    return %c0_i32, %c0_i32_0 : i32, i32
  }
  func.func @transform_2(%arg0: i32) -> (i32, i32) {
    %c0_i32 = arith.constant 0 : i32
    %c0_i32_0 = arith.constant 0 : i32
    %c0_i32_1 = arith.constant 0 : i32
    return %c0_i32, %c0_i32_0 : i32, i32
  }
  func.func @transform_3(%arg0: i32) -> (i32, i32) {
    %c0_i32 = arith.constant 0 : i32
    %c0_i32_0 = arith.constant 0 : i32
    %c0_i32_1 = arith.constant 0 : i32
    return %c0_i32, %c0_i32_0 : i32, i32
  }
  func.func @transform_4(%arg0: i32) -> (i32, i32) {
    %c0_i32 = arith.constant 0 : i32
    %c0_i32_0 = arith.constant 0 : i32
    return %arg0, %c0_i32 : i32, i32
  }
}

</mosaic_0001>

<bundles_post_ra>
// kernel: tpu_custom_call.1
= control target key start
LH: loop header
LB: loop body
LE: loop exit
PB: predicated region body
PF: predicated region fallthrough
CT: control target
= control target key end

     0   :  { %9 = vsyncpa [#allocation3], 0  ;;  %s657_s0 = inlined_call_operand.vmem [shape: s32[16,1], index: 0, kind: input, shape index: {}]   ;;  %s658_s1 = inlined_call_operand.vmem [shape: bf16[16,128], index: 1, kind: input, shape index: {}]   ;;  %s659_s2 = inlined_call_operand.hbm [shape: bf16[128,384], index: 2, kind: input, shape index: {}]   ;;  %s660_s3 = inlined_call_operand.vmem [shape: f32[1,384], index: 3, kind: input, shape index: {}]   ;;  %s661_s4 = inlined_call_operand.hbm [shape: bf16[16,384], index: 4, kind: output, shape index: {}]  }
   0x1   :  { %10 = vsyncpa [#allocation4], 0  ;;  %s568_s15 = smov [#allocation2]   ;;  %s520_s19 = scalar_lea.hbm %s659_s2, 3072 }
   0x2   :  { %s20_s16 = sshll.u32 %s568_s15, 4  ;;  %p521_p0 = scmp.ne.s32.totalorder %s659_s2, %s520_s19  ;;  %s21_s16 = int_to_ptr.vmem [resolvable:$true] %s20_s16 }
   0x3   :  { %p524_p1 = scmp.lt.u32.totalorder %s520_s19, %s659_s2 }
   0x5   :  { %p526_p2 = pnand %p524_p1, %p521_p0 }
   0x7   :  { %529 = shalt.err (!%p526_p2)
}
   0x8   :  { %s530_s24 = scalar_lea.vmem %s21_s16, 3072  ;;  %p535_p4 = scmp.lt.s32.totalorder %s21_s16, %s21_s16 }
   0x9   :  { %p531_p3 = scmp.ne.s32.totalorder %s21_s16, %s530_s24  ;;  %p536_p5 = scmp.lt.s32.totalorder %s530_s24, %s530_s24 }
   0xb   :  { %p537_p6 = por %p536_p5, %p535_p4 }
   0xd   :  { %p538_p7 = pnand %p537_p6, %p531_p3 }
   0xf   :  { %541 = shalt.err (!%p538_p7)
}
  0x10   :  { %s569_s25 = smov 192   ;;  %s570_s26 = smov 12  }
  0x11   :  { %26 = dma.hbm_to_vmem [thread:$0]  %s659_s2, 3072, %s21_s16, [#allocation3], %s569_s25, %s569_s25, %s570_s26  }
  0x12   :  { %564 = dma.done.wait [#allocation3], 3072  }
  0x13   :  { %565 = vsyncadd [#allocation3], 4294964224  ;;  %v571_v0 = vmov 0   ;;  %v572_v1 = vmov 0.0   ;;  %v33_v2 = vld [vmem:[%s657_s0] sm:$0xff]  ;;  %v34_v3 = vld [vmem:[%s657_s0 + $0x8] sm:$0xff]  ;;  %v35_v19 = vlaneseq }
  0x14   :  { %486 = vset.pattern.permute.xlu0 %v571_v0  ;;  %453 = vmatprep.subr.bf16.mxu0 %v572_v1  ;;  %v487_v4 = vld [vmem:[%s658_s1] sm:$0xff]   ;;  %vm573_vm0 = vmmov 0   ;;  %v492_v7 = vld [vmem:[#allocation2 + $0x1c] ss:$12 sps:$4 sm:$0xff]   ;;  %v500_v11 = vld [vmem:[#allocation2 + $0x4c] ss:$12 sps:$4 sm:$0xff]  }
  0x15   :  { %313 = vmatprep.mubr.bf16.mxu1 %v571_v0  ;;  %38 = vperm.xlu0 %486, %v33_v2   ;;  %v488_v5 = vld [vmem:[#allocation2 + $0x4] ss:$12 sps:$4 sm:$0xff]   ;;  %v490_v6 = vld [vmem:[#allocation2] ss:$12 sps:$4 sm:$0xff]   ;;  %v502_v12 = vld [vmem:[#allocation2 + $0x48] ss:$12 sps:$4 sm:$0xff]  }
  0x16   :  { %454 = vmatpush3.bf16.msra.mxu0 %v487_v4  ;;  %455 = vmatprep.mubr.msk.bf16.mxu0 %vm573_vm0, %v572_v1  ;;  %v494_v8 = vld [vmem:[#allocation2 + $0x18] ss:$12 sps:$4 sm:$0xff]   ;;  %v496_v9 = vld [vmem:[#allocation2 + $0x34] ss:$12 sps:$4 sm:$0xff]   ;;  %v498_v10 = vld [vmem:[#allocation2 + $0x30] ss:$12 sps:$4 sm:$0xff]  }
  0x17   :  { %459 = vmatprep.subr.bf16.mxu0 %v572_v1  ;;  %281 = vmatprep.subr.bf16.mxu1 %v488_v5  ;;  %v504_v13 = vld [vmem:[#allocation2 + $0x64] ss:$12 sps:$4 sm:$0xff]   ;;  %v506_v14 = vld [vmem:[#allocation2 + $0x60] ss:$12 sps:$4 sm:$0xff]   ;;  %v508_v15 = vld [vmem:[#allocation2 + $0x7c] ss:$12 sps:$4 sm:$0xff]  }
  0x18   :  { %282 = vmatpush1.bf16.msra.mxu1 %v490_v6  ;;  %v510_v16 = vld [vmem:[#allocation2 + $0x78] ss:$12 sps:$4 sm:$0xff]   ;;  %v512_v17 = vld [vmem:[#allocation2 + $0x94] ss:$12 sps:$4 sm:$0xff]   ;;  %v514_v18 = vld [vmem:[#allocation2 + $0x90] ss:$12 sps:$4 sm:$0xff]  }
  0x19   :  { %41 = vperm.xlu0 %486, %v34_v3   ;;  %283 = vmatprep.subr.bf16.mxu1 %v492_v7  ;;  %v36_v20 = vand.u32 127, %v35_v19  ;;  %vm58_vm3 = vcmask 130048   ;;  %v491_v25 = vld [vmem:[#allocation2 + $0x8] ss:$12 sps:$4 sm:$0xff]   ;;  %v495_v27 = vld [vmem:[#allocation2 + $0x20] ss:$12 sps:$4 sm:$0xff]  }
  0x1a   :  { %v499_v28 = vld [vmem:[#allocation2 + $0x38] ss:$12 sps:$4 sm:$0xff]   ;;  %v503_v29 = vld [vmem:[#allocation2 + $0x50] ss:$12 sps:$4 sm:$0xff]   ;;  %v507_v30 = vld [vmem:[#allocation2 + $0x68] ss:$12 sps:$4 sm:$0xff]  }
  0x1b   :  { %v511_v31 = vld [vmem:[#allocation2 + $0x80] ss:$12 sps:$4 sm:$0xff]   ;;  %v515_v32 = vld [vmem:[#allocation2 + $0x98] ss:$12 sps:$4 sm:$0xff]   ;;  %v518_v34 = vld [vmem:[#allocation2 + $0xa8] ss:$12 sps:$4 sm:$0xff]  }
  0x1c   :  { %284 = vmatpush1.bf16.msra.mxu1 %v494_v8  ;;  %v516_v33 = vld [vmem:[#allocation2 + $0xac] ss:$12 sps:$4 sm:$0xff]   ;;  %v519_v35 = vld [vmem:[#allocation2 + $0xb0] ss:$12 sps:$4 sm:$0xff]   ;;  %v139_v41 = vshrl.u32 %v35_v19, 7  ;;  %s574_s2 = smov [#allocation5]  }
  0x1d   :  { %285 = vmatprep.subr.bf16.mxu1 %v496_v9  ;;  %v136_v44 = vld [vmem:[%s660_s3] sm:$0x7]  ;;  %s394_s3 = sshll.u32 %s574_s2, 4  ;;  %s395_s3 = int_to_ptr.vmem [resolvable:$true] %s394_s3 }
  0x1e   :  { %v140_v42 = vsub.s32 0, %v139_v41  ;;  %v148_v43 = vsub.s32 2, %v139_v41  ;;  %v144_v45 = vsub.s32 1, %v139_v41  ;;  %s542_s9 = scalar_lea.vmem %s395_s3, 384  ;;  %p547_p9 = scmp.lt.s32.totalorder %s395_s3, %s395_s3 }
  0x1f   :  { %p543_p8 = scmp.ne.s32.totalorder %s395_s3, %s542_s9  ;;  %p548_p10 = scmp.lt.s32.totalorder %s542_s9, %s542_s9 }
  0x20   :  { %286 = vmatpush1.bf16.msra.mxu1 %v498_v10  ;;  %v141_v46 = vrot.slane %v136_v44, %v140_v42  ;;  %v149_v47 = vrot.slane %v136_v44, %v148_v43  ;;  %v145_v48 = vrot.slane %v136_v44, %v144_v45 }
  0x21   :  { %287 = vmatprep.subr.bf16.mxu1 %v500_v11  ;;  %p549_p11 = por %p548_p10, %p547_p9 }
  0x23   :  { %p550_p12 = pnand %p549_p11, %p543_p8 }
  0x24   :  { %288 = vmatpush1.bf16.msra.mxu1 %v502_v12 }
  0x25   :  { %289 = vmatprep.subr.bf16.mxu1 %v504_v13 }
  0x28   :  { %290 = vmatpush1.bf16.msra.mxu1 %v506_v14 }
  0x29   :  { %291 = vmatprep.subr.bf16.mxu1 %v508_v15 }
  0x2c   :  { %292 = vmatpush1.bf16.msra.mxu1 %v510_v16 }
  0x2d   :  { %293 = vmatprep.subr.bf16.mxu1 %v512_v17 }
  0x30   :  { %294 = vmatpush1.bf16.msra.mxu1 %v514_v18 }
  0x31   :  { %295 = vmatprep.subr.bf16.mxu1 %v516_v33 }
  0x34   :  { %296 = vmatpush1.bf16.msra.mxu1 %v518_v34 }
  0x94   :  { %v39_v21 = vpop.permute.xlu0 %38 }
  0x95   :  { %vm43_vm1 = vcmp.eq.s32.totalorder %v39_v21, %v36_v20 }
  0x96   :  { %v406_v23 = vsel %vm43_vm1, 1.0, %v572_v1 }
  0x98   :  { %v42_v22 = vpop.permute.xlu0 %41 }
  0x99   :  { %vm44_vm2 = vcmp.eq.s32.totalorder %v42_v22, %v36_v20 }
  0x9a   :  { %v407_v24 = vsel %vm44_vm2, 1.0, %v572_v1 }
  0x9b   :  { %v49_v26 = vpack.c.bf16 %v407_v24, %v406_v23 }
  0x9d   :  { %456 = vmatmul.mubr.msk.bf16.vlgmr.msra.gmra.mrb[0].mxu0 %vm58_vm3, %v49_v26 }
  0x9e   :  { %460 = vmatpush3.bf16.msra.mxu0 %v491_v25  ;;  %475 = vmatprep.mubr.msk.bf16.mxu0 %vm573_vm0, %v572_v1 }
  0x9f   :  { %461 = vmatprep.subr.bf16.mxu0 %v572_v1 }
  0xa2   :  { %462 = vmatpush3.bf16.msra.mxu0 %v495_v27 }
  0xa3   :  { %463 = vmatprep.subr.bf16.mxu0 %v572_v1 }
  0xa6   :  { %464 = vmatpush3.bf16.msra.mxu0 %v499_v28 }
  0xa7   :  { %465 = vmatprep.subr.bf16.mxu0 %v572_v1 }
  0xaa   :  { %466 = vmatpush3.bf16.msra.mxu0 %v503_v29 }
  0xab   :  { %467 = vmatprep.subr.bf16.mxu0 %v572_v1 }
  0xae   :  { %468 = vmatpush3.bf16.msra.mxu0 %v507_v30 }
  0xaf   :  { %469 = vmatprep.subr.bf16.mxu0 %v572_v1 }
  0xb2   :  { %470 = vmatpush3.bf16.msra.mxu0 %v511_v31 }
  0xb3   :  { %471 = vmatprep.subr.bf16.mxu0 %v572_v1 }
  0xb6   :  { %472 = vmatpush3.bf16.msra.mxu0 %v515_v32 }
  0xb7   :  { %473 = vmatprep.subr.bf16.mxu0 %v572_v1 }
  0xba   :  { %474 = vmatpush3.bf16.msra.mxu0 %v519_v35 }
 0x170   :  { %v96_v36 = vpop.f32.mrb[0].mxu0 }
 0x171   :  { %v457_v37 = vpop.f32.mrb[1].mxu0 }
 0x172   :  { %v99_v38 = vpop.f32.mrb[2].mxu0 }
 0x173   :  { %v103_v39 = vpack.c.bf16 %v99_v38, %v96_v36  ;;  %v458_v40 = vpop.f32.mrb[3].mxu0 }
 0x175   :  { %314 = vmatmul.mubr.bf16.vlgmr.msra.gmra.mrb[0].mxu1 %v103_v39  ;;  %476 = vmatmul.mubr.bf16.vlgmr.msra.gmra.mrb[4].mxu0 %v103_v39 }
 0x248   :  { %v315_v49 = vpop.f32.mrb[0].mxu1  ;;  %v358_v50 = vpop.f32.mrb[4].mxu0 }
 0x249   :  { %v316_v51 = vadd.f32 %v315_v49, %v141_v46  ;;  %v359_v52 = vadd.f32 %v358_v50, %v149_v47  ;;  %v317_v53 = vpop.f32.mrb[1].mxu1  ;;  %v477_v54 = vpop.f32.mrb[5].mxu0 }
 0x24a   :  { %v318_v55 = vadd.f32 %v317_v53, %v145_v48  ;;  %v319_v56 = vpop.f32.mrb[2].mxu1  ;;  %v361_v57 = vpop.f32.mrb[6].mxu0 }
 0x24b   :  { %v439_v58 = vpack.c.bf16 %v359_v52, %v359_v52  ;;  %v320_v59 = vadd.f32 %v319_v56, %v141_v46  ;;  %v362_v60 = vadd.f32 %v361_v57, %v149_v47  ;;  %v321_v61 = vpop.f32.mrb[3].mxu1  ;;  %v478_v62 = vpop.f32.mrb[7].mxu0 }
 0x24c   :  { %v438_v63 = vpack.c.bf16 %v318_v55, %v316_v51  ;;  %v322_v0 = vadd.f32 %v321_v61, %v145_v48 }
 0x24d   :  { %386 = vst [vmem:[#allocation5 + $0x8] sm:$0xf] %v439_v58  ;;  %v441_v1 = vpack.c.bf16 %v362_v60, %v362_v60 }
 0x24e   :  { %385 = vst [vmem:[#allocation5] sm:$0xff] %v438_v63  ;;  %v440_v2 = vpack.c.bf16 %v322_v0, %v320_v59 }
 0x24f   :  { %388 = vst [vmem:[#allocation5 + $0x14] sm:$0xf] %v441_v1 }
 0x250   :  { %387 = vst [vmem:[#allocation5 + $0xc] sm:$0xff] %v440_v2 }
 0x251   :  { %553 = shalt.err (!%p550_p12)
}
 0x252   :  { %s554_s12 = scalar_lea.hbm %s661_s4, 384 }
 0x253   :  { %p555_p13 = scmp.ne.s32.totalorder %s661_s4, %s554_s12  ;;  %p558_p0 = scmp.lt.u32.totalorder %s554_s12, %s661_s4 }
 0x255   :  { %p560_p1 = pnand %p558_p0, %p555_p13 }
 0x257   :  { %563 = shalt.err (!%p560_p1)
}
 0x258   :  { %400 = dma.vmem_to_hbm [thread:$0]  %s395_s3, 384, %s661_s4, [#allocation4], %s569_s25, %s569_s25, %s570_s26  }
 0x259   :  { %566 = dma.done.wait [#allocation4], 384  }
 0x25a   :  { %567 = vsyncadd [#allocation4], 4294966912 }
 0x25b   :  { %404 = vsyncpa [#allocation3], 1 }
 0x25c   :  { %405 = vsyncpa [#allocation4], 1 }

</bundles_post_ra>
